<compile_context>
chip_gen: v5e
topology: v5e:2x2
jax: 0.10.0
libtpu: 0.0.40
codegen_flags: <defaults>
</compile_context>

<pallas_src>
import math

import jax
import jax.numpy as jnp
from jax.experimental import pallas as pl
from jax.experimental.pallas import tpu as pltpu


def _round_up(x, m):
    return -(-x // m) * m


# ----------------------------------------------------------------------------
# Pallas kernel: fused IPA attention core (one batch element x one q-row tile)
# ----------------------------------------------------------------------------
def _ipa_attn_kernel(qf_ref, kf_ref, vf_ref, bias_ref, pz_ref,
                     ov_ref, opair_ref, a_scr):
    # qf_ref   : [1, tq, H*Dk]  packed queries (q*scale || sqrt(w)q_pt || -.5|q_pt|^2 || 1)
    # kf_ref   : [1, N , H*Dk]  packed keys    (k       || sqrt(w)k_pt || 1 || -.5|k_pt|^2)
    # vf_ref   : [1, N , H*Ev]  packed values  (v || v_pt), global frame
    # bias_ref : [1, H, tq, N]  sqrt(1/3)*pair_bias + mask_bias
    # pz_ref   : [1, tq, N, Cz4] down_z(z) rows for this query tile
    # ov_ref   : [1, tq, H*Ev]  per-head [o || o_pt] (global frame)
    # opair_ref: [1, tq, H, Cz4]
    # a_scr    : VMEM [tq, H, N] f32 — stacked attention for the o_pair bmm
    H = bias_ref.shape[1]
    Dk = qf_ref.shape[-1] // H
    Ev = vf_ref.shape[-1] // H
    contract_last = (((1,), (1,)), ((), ()))

    for h in range(H):                                     # unrolled; H is small
        qh = qf_ref[0, :, h * Dk:(h + 1) * Dk]             # [tq, Dk]
        kh = kf_ref[0, :, h * Dk:(h + 1) * Dk]             # [N,  Dk]
        # one MXU call = scalar QK term + point-attention term
        logits = jax.lax.dot_general(qh, kh, contract_last,
                                     preferred_element_type=jnp.float32)
        logits = logits + bias_ref[0, h, :, :].astype(jnp.float32)

        # softmax over keys; normalization via approximate reciprocal (EUP)
        m = jnp.max(logits, axis=-1, keepdims=True)
        e = jnp.exp(logits - m)
        l = jnp.sum(e, axis=-1, keepdims=True)
        a = e * pl.reciprocal(l, approx=True)              # [tq, N] f32

        # stack attention for the single o_pair batched matmul below
        a_scr[:, h, :] = a

        # o and o_pt for this head in one matmul; store straight into the
        # (VMEM) output block — no python-list accumulators / concatenate.
        vh = vf_ref[0, :, h * Ev:(h + 1) * Ev]             # [N, Ev]
        ov = jnp.dot(a.astype(vh.dtype), vh, preferred_element_type=jnp.float32)
        ov_ref[0, :, h * Ev:(h + 1) * Ev] = ov.astype(ov_ref.dtype)

    # o_pair for ALL heads with ONE batched matmul (batch = query row):
    # pz is streamed from VMEM once instead of H times, work goes to the MXU.
    pz = pz_ref[0]                                         # [tq, N, Cz4]
    a_all = a_scr[...]                                     # [tq, H, N]
    opair = jax.lax.dot_general(
        a_all.astype(pz.dtype), pz,
        dimension_numbers=(((2,), (1,)), ((0,), (0,))),    # 'qhn,qnc->qhc'
        preferred_element_type=jnp.float32)                # [tq, H, Cz4]
    opair_ref[0] = opair.astype(opair_ref.dtype)


def _vmem_limit_bytes():
    # Raise the default scoped limit on v5e/v6e (128 MiB physical), bound it
    # safely below the 64 MiB physical VMEM on v7x.
    try:
        cap = pltpu.get_tpu_info().vmem_capacity_bytes
    except Exception:
        cap = 64 * 1024 * 1024
    return int(min(96 * 1024 * 1024, (cap * 3) // 4))


def _ipa_attention_pallas(qfeat, kfeat, vfeat, attn_bias, pair_z, *, tq=128):
    B, N, HDk = qfeat.shape
    H = attn_bias.shape[1]
    HEv = vfeat.shape[-1]
    Cz4 = pair_z.shape[-1]

    tq = min(tq, N)
    if tq != N:
        tq = max(8, (tq // 8) * 8)      # second-minor block dim: multiple of 8
    grid = (B, pl.cdiv(N, tq))          # ragged last tile handled by Pallas

    row_map = lambda b, i: (b, i, 0)
    key_map = lambda b, i: (b, 0, 0)

    out_shapes = (
        jax.ShapeDtypeStruct((B, N, HEv), qfeat.dtype),        # [o || o_pt] packed
        jax.ShapeDtypeStruct((B, N, H, Cz4), qfeat.dtype),     # o_pair
    )
    # TODO(synk): for very long sequences (esp. v7x, 64 MiB VMEM) add a key-tile
    # grid axis (flash-style online softmax) so VMEM stops scaling with N, and
    # fuse the linear_b / down_z projections from a [tq, tk, Cz] z tile.
    return pl.pallas_call(
        _ipa_attn_kernel,
        out_shape=out_shapes,
        grid_spec=pltpu.PrefetchScalarGridSpec(
            num_scalar_prefetch=0,
            grid=grid,
            in_specs=[
                pl.BlockSpec((1, tq, HDk), row_map),                     # packed q
                pl.BlockSpec((1, N, HDk), key_map),                      # packed k (full keys)
                pl.BlockSpec((1, N, HEv), key_map),                      # packed v
                pl.BlockSpec((1, H, tq, N), lambda b, i: (b, 0, i, 0)),  # bias (+mask)
                pl.BlockSpec((1, tq, N, Cz4), lambda b, i: (b, i, 0, 0)),  # down_z(z)
            ],
            out_specs=[
                pl.BlockSpec((1, tq, HEv), row_map),
                pl.BlockSpec((1, tq, H, Cz4), lambda b, i: (b, i, 0, 0)),
            ],
            scratch_shapes=[pltpu.VMEM((tq, H, N), jnp.float32)],
        ),
        compiler_params=pltpu.CompilerParams(
            dimension_semantics=("parallel", "parallel"),
            vmem_limit_bytes=_vmem_limit_bytes()),
    )(qfeat, kfeat, vfeat, attn_bias, pair_z)


# ----------------------------------------------------------------------------
# Plain-JAX glue (cheap O(N) work) + full forward
# ----------------------------------------------------------------------------
def _project_points(s, w, b, rot, trans, H, P):
    """linear -> split xyz -> apply rigid (R @ p + t) -> [B, N, H, P, 3]."""
    B, N, _ = s.shape
    p = jnp.dot(s, w) + b                                    # [B, N, 3*H*P]
    p = p.reshape(B, N, 3, H * P).transpose(0, 1, 3, 2)      # [B, N, H*P, 3]
    p = jnp.einsum('bnij,bnpj->bnpi', rot, p) + trans[:, :, None, :]
    return p.reshape(B, N, H, P, 3)


def ipa_forward(s, z, rot, trans, mask, params, cfg, *, tq=128):
    H, C = cfg['no_heads'], cfg['c_hidden']
    Pq, Pv = cfg['no_qk_points'], cfg['no_v_points']
    inf, eps = cfg['inf'], cfg['eps']
    B, N, _ = s.shape

    # per-residue projections -------------------------------------------------
    q = (jnp.dot(s, params['wq']) + params['bq']).reshape(B, N, H, C)
    kv = (jnp.dot(s, params['wkv']) + params['bkv']).reshape(B, N, H, 2 * C)
    k, v = kv[..., :C], kv[..., C:]

    qp = _project_points(s, params['wqp'], params['bqp'], rot, trans, H, Pq)
    kvp = _project_points(s, params['wkvp'], params['bkvp'], rot, trans, H, Pq + Pv)
    kp, vp = kvp[..., :Pq, :], kvp[..., Pq:, :]

    # fold softplus(head_weights)*sqrt(1/(3*Pq*9/2)) into the point clouds and
    # sqrt(1/(3*C)) into q, so the kernel logit is ONE fused matmul per head.
    hw = jax.nn.softplus(params['head_weights']) * math.sqrt(
        1.0 / (3.0 * (Pq * 9.0 / 2.0)))
    sqrt_hw = jnp.sqrt(hw)[None, None, :, None, None]
    scale_qk = math.sqrt(1.0 / (3.0 * C))

    qp_s = qp * sqrt_hw
    kp_s = kp * sqrt_hw
    qsq = jnp.sum(qp_s * qp_s, axis=(-2, -1))                # [B, N, H]
    ksq = jnp.sum(kp_s * kp_s, axis=(-2, -1))                # [B, N, H]
    ones = jnp.ones_like(qsq)

    # per-head packed contraction features, lane-dense [B, N, H*Dkp]
    Dk = C + Pq * 3 + 2
    Dkp = _round_up(Dk, 8)
    Ev = C + Pv * 3
    Evp = _round_up(Ev, 8)

    def pad_last(x, width):
        extra = width - x.shape[-1]
        if extra == 0:
            return x
        return jnp.pad(x, [(0, 0)] * (x.ndim - 1) + [(0, extra)])

    qfeat = jnp.concatenate(
        [q * scale_qk, qp_s.reshape(B, N, H, Pq * 3),
         -0.5 * qsq[..., None], ones[..., None]], axis=-1)
    kfeat = jnp.concatenate(
        [k, kp_s.reshape(B, N, H, Pq * 3),
         ones[..., None], -0.5 * ksq[..., None]], axis=-1)
    vfeat = jnp.concatenate([v, vp.reshape(B, N, H, Pv * 3)], axis=-1)
    qfeat = pad_last(qfeat, Dkp).reshape(B, N, H * Dkp)
    kfeat = pad_last(kfeat, Dkp).reshape(B, N, H * Dkp)
    vfeat = pad_last(vfeat, Evp).reshape(B, N, H * Evp)

    # O(N^2) derived inputs streamed by the kernel.
    # (On v5e these two can be cast to bf16 to halve the dominant HBM stream;
    #  kept f32 here so the check against the f32 reference stays tight.)
    b_pair = jnp.dot(z, params['wb']) + params['bb']                  # [B,N,N,H]
    mask_bias = inf * (mask[:, :, None] * mask[:, None, :] - 1.0)     # [B,N,N]
    attn_bias = (math.sqrt(1.0 / 3.0) * jnp.transpose(b_pair, (0, 3, 1, 2))
                 + mask_bias[:, None, :, :])                          # [B,H,N,N]
    pair_z = jnp.dot(z, params['wdz']) + params['bdz']                # [B,N,N,Cz4]

    # fused attention core -----------------------------------------------------
    ov, o_pair = _ipa_attention_pallas(qfeat, kfeat, vfeat, attn_bias, pair_z, tq=tq)

    ov = ov.reshape(B, N, H, Evp)
    o = ov[..., :C].reshape(B, N, H * C)
    o_pt = ov[..., C:C + Pv * 3].reshape(B, N, H, Pv, 3)
    o_pair = o_pair.reshape(B, N, H * pair_z.shape[-1])

    # back to the local frame + output features --------------------------------
    o_pt = jnp.einsum('bnji,bnhpj->bnhpi', rot,
                      o_pt - trans[:, :, None, None, :])              # R^T (x - t)
    o_pt_norm = jnp.sqrt(jnp.sum(o_pt * o_pt, axis=-1) + eps).reshape(B, N, H * Pv)
    o_pt_flat = o_pt.reshape(B, N, H * Pv, 3)

    feats = jnp.concatenate(
        [o, o_pt_flat[..., 0], o_pt_flat[..., 1], o_pt_flat[..., 2],
         o_pt_norm, o_pair], axis=-1)
    # TODO(synk): the _offload_inference CPU-offload branch of the module has
    # no Pallas equivalent and is not implemented.
    return jnp.dot(feats, params['wout']) + params['bout']


# ----------------------------------------------------------------------------
# Pure-JAX reference (faithful port of the PyTorch forward) for verification
# ----------------------------------------------------------------------------
def ipa_reference(s, z, rot, trans, mask, params, cfg):
    H, C = cfg['no_heads'], cfg['c_hidden']
    Pq, Pv = cfg['no_qk_points'], cfg['no_v_points']
    inf, eps = cfg['inf'], cfg['eps']
    B, N, _ = s.shape

    q = (jnp.dot(s, params['wq']) + params['bq']).reshape(B, N, H, C)
    kv = (jnp.dot(s, params['wkv']) + params['bkv']).reshape(B, N, H, 2 * C)
    k, v = kv[..., :C], kv[..., C:]
    qp = _project_points(s, params['wqp'], params['bqp'], rot, trans, H, Pq)
    kvp = _project_points(s, params['wkvp'], params['bkvp'], rot, trans, H, Pq + Pv)
    kp, vp = kvp[..., :Pq, :], kvp[..., Pq:, :]

    b_pair = jnp.dot(z, params['wb']) + params['bb']

    a = jnp.einsum('bihc,bjhc->bhij', q, k) * math.sqrt(1.0 / (3.0 * C))
    a = a + math.sqrt(1.0 / 3.0) * jnp.transpose(b_pair, (0, 3, 1, 2))

    disp = qp[:, :, None, :, :, :] - kp[:, None, :, :, :, :]   # [B,Ni,Nj,H,Pq,3]
    pt_att = jnp.sum(disp * disp, axis=-1)
    hw = jax.nn.softplus(params['head_weights']) * math.sqrt(
        1.0 / (3.0 * (Pq * 9.0 / 2.0)))
    pt_att = jnp.sum(pt_att * hw[None, None, None, :, None], axis=-1) * (-0.5)
    sq_mask = inf * (mask[:, :, None] * mask[:, None, :] - 1.0)
    a = a + jnp.transpose(pt_att, (0, 3, 1, 2)) + sq_mask[:, None, :, :]
    a = jax.nn.softmax(a, axis=-1)

    o = jnp.einsum('bhij,bjhc->bihc', a, v).reshape(B, N, H * C)
    o_pt = jnp.einsum('bhij,bjhpd->bihpd', a, vp)
    o_pt = jnp.einsum('bnji,bnhpj->bnhpi', rot, o_pt - trans[:, :, None, None, :])
    o_pt_norm = jnp.sqrt(jnp.sum(o_pt * o_pt, axis=-1) + eps).reshape(B, N, H * Pv)
    o_pt_flat = o_pt.reshape(B, N, H * Pv, 3)
    pair_z = jnp.dot(z, params['wdz']) + params['bdz']
    o_pair = jnp.einsum('bhij,bijc->bihc', a, pair_z).reshape(B, N, -1)

    feats = jnp.concatenate(
        [o, o_pt_flat[..., 0], o_pt_flat[..., 1], o_pt_flat[..., 2],
         o_pt_norm, o_pair], axis=-1)
    return jnp.dot(feats, params['wout']) + params['bout']


# ----------------------------------------------------------------------------
# Test helpers
# ----------------------------------------------------------------------------
def quat_to_rot(quat):
    q = quat / jnp.linalg.norm(quat, axis=-1, keepdims=True)
    w, x, y, z = q[..., 0], q[..., 1], q[..., 2], q[..., 3]
    R = jnp.stack([
        1 - 2 * (y * y + z * z), 2 * (x * y - w * z), 2 * (x * z + w * y),
        2 * (x * y + w * z), 1 - 2 * (x * x + z * z), 2 * (y * z - w * x),
        2 * (x * z - w * y), 2 * (y * z + w * x), 1 - 2 * (x * x + y * y),
    ], axis=-1)
    return R.reshape(quat.shape[:-1] + (3, 3))


def make_params(key, cfg):
    """Deterministic synthetic weights (shapes match the PyTorch module).
    Weights stored as [in, out]. NOTE: torch's 'final' init zeros linear_out;
    small random values keep the test non-trivial. Head weights are perturbed
    around softplus^-1(1) so the per-head folding is actually exercised."""
    c_s, c_z, C = cfg['c_s'], cfg['c_z'], cfg['c_hidden']
    H, Pq, Pv = cfg['no_heads'], cfg['no_qk_points'], cfg['no_v_points']
    hc = H * C
    cz4 = c_z // 4
    concat_dim = H * (cz4 + C + Pv * 4)
    ks = jax.random.split(key, 7)

    def w(k, fi, fo, scale=1.0):
        return (scale / math.sqrt(fi)) * jax.random.normal(k, (fi, fo), jnp.float32)

    return {
        'wq': w(ks[0], c_s, hc), 'bq': jnp.zeros((hc,), jnp.float32),
        'wkv': w(ks[1], c_s, 2 * hc), 'bkv': jnp.zeros((2 * hc,), jnp.float32),
        'wqp': w(ks[2], c_s, H * Pq * 3), 'bqp': jnp.zeros((H * Pq * 3,), jnp.float32),
        'wkvp': w(ks[3], c_s, H * (Pq + Pv) * 3),
        'bkvp': jnp.zeros((H * (Pq + Pv) * 3,), jnp.float32),
        'wb': w(ks[4], c_z, H), 'bb': jnp.zeros((H,), jnp.float32),
        'wdz': w(ks[5], c_z, cz4), 'bdz': jnp.zeros((cz4,), jnp.float32),
        'head_weights': (0.541324854612918
                         + 0.3 * jnp.arange(H, dtype=jnp.float32) / max(H, 1)),
        'wout': w(ks[6], concat_dim, c_s, scale=0.1),
        'bout': jnp.zeros((c_s,), jnp.float32),
    }


if __name__ == "__main__":
    cfg = dict(c_s=32, c_z=16, c_hidden=16, c_skip=8,   # c_skip unused in forward
               no_heads=4, no_qk_points=4, no_v_points=8, inf=1e5, eps=1e-8)
    B, N = 2, 16

    key = jax.random.PRNGKey(0)
    k_s, k_z, k_q, k_t, k_p = jax.random.split(key, 5)

    s = jax.random.normal(k_s, (B, N, cfg['c_s']), jnp.float32)
    z = jax.random.normal(k_z, (B, N, N, cfg['c_z']), jnp.float32)
    rot = quat_to_rot(jax.random.normal(k_q, (B, N, 4), jnp.float32))
    trans = jax.random.normal(k_t, (B, N, 3), jnp.float32)
    mask = (jnp.arange(N)[None, :] < jnp.array([[N], [N - 3]])).astype(jnp.float32)
    params = make_params(k_p, cfg)

    # tq=8 with N=16 exercises a multi-row-tile grid: grid = (B=2, N/tq=2)
    out = ipa_forward(s, z, rot, trans, mask, params, cfg, tq=8)
    out = jax.block_until_ready(out)

    ref = ipa_reference(s, z, rot, trans, mask, params, cfg)
    assert out.shape == (B, N, cfg['c_s']), out.shape
    assert not bool(jnp.any(jnp.isnan(out))), "NaN in kernel output"
    max_diff = float(jnp.max(jnp.abs(out - ref)))
    # approximate-reciprocal softmax normalization => slightly looser tolerance
    assert jnp.allclose(out, ref, atol=2e-3, rtol=2e-3), max_diff

    print("KERNEL_OK")
</pallas_src>

<mosaic_0001>
module attributes {stable_mosaic.version = 11 : i64} {
  func.func @_ipa_attn_kernel(%arg0: i32, %arg1: i32, %arg2: memref<1x8x128xf32, #tpu.memory_space<vmem>>, %arg3: memref<1x16x128xf32, #tpu.memory_space<vmem>>, %arg4: memref<1x16x160xf32, #tpu.memory_space<vmem>>, %arg5: memref<1x4x8x16xf32, #tpu.memory_space<vmem>>, %arg6: memref<1x8x16x4xf32, #tpu.memory_space<vmem>>, %arg7: memref<1x8x160xf32, #tpu.memory_space<vmem>>, %arg8: memref<1x8x4x4xf32, #tpu.memory_space<vmem>>, %arg9: memref<8x4x16xf32, #tpu.memory_space<vmem>>) attributes {dimension_semantics = [#tpu.dimension_semantics<parallel>, #tpu.dimension_semantics<parallel>], iteration_bounds = array<i64: 2, 2>, scalar_prefetch = 0 : i64, scratch_operands = 1 : i64, tpu.core_type = #tpu.core_type<tc>, window_params = [{transform_indices = @transform_0, window_bounds = array<i64: 1, 8, 128>}, {transform_indices = @transform_1, window_bounds = array<i64: 1, 16, 128>}, {transform_indices = @transform_2, window_bounds = array<i64: 1, 16, 160>}, {transform_indices = @transform_3, window_bounds = array<i64: 1, 4, 8, 16>}, {transform_indices = @transform_4, window_bounds = array<i64: 1, 8, 16, 4>}, {transform_indices = @transform_5, window_bounds = array<i64: 1, 8, 160>}, {transform_indices = @transform_6, window_bounds = array<i64: 1, 8, 4, 4>}]} {
    %c0 = arith.constant 0 : index
    %c0_0 = arith.constant 0 : index
    %c0_1 = arith.constant 0 : index
    %0 = vector.load %arg2[%c0, %c0_0, %c0_1] : memref<1x8x128xf32, #tpu.memory_space<vmem>>, vector<1x8x32xf32>
    %1 = vector.shape_cast %0 : vector<1x8x32xf32> to vector<8x32xf32>
    %c0_2 = arith.constant 0 : index
    %c0_3 = arith.constant 0 : index
    %c0_4 = arith.constant 0 : index
    %2 = vector.load %arg3[%c0_2, %c0_3, %c0_4] : memref<1x16x128xf32, #tpu.memory_space<vmem>>, vector<1x16x32xf32>
    %3 = vector.shape_cast %2 : vector<1x16x32xf32> to vector<16x32xf32>
    %cst = arith.constant dense<0.000000e+00> : vector<8x16xf32>
    %4 = tpu.matmul %1, %3, %cst {dimension_numbers = #tpu.dot_dimension_numbers<[1], [1], [0], [0], [0, 0, 1, 0], [], []>} : vector<8x32xf32>, vector<16x32xf32>, vector<8x16xf32> -> vector<8x16xf32>
    %c0_5 = arith.constant 0 : index
    %c0_6 = arith.constant 0 : index
    %c0_7 = arith.constant 0 : index
    %c0_8 = arith.constant 0 : index
    %5 = vector.load %arg5[%c0_5, %c0_6, %c0_7, %c0_8] : memref<1x4x8x16xf32, #tpu.memory_space<vmem>>, vector<1x1x8x16xf32>
    %6 = vector.shape_cast %5 : vector<1x1x8x16xf32> to vector<8x16xf32>
    %7 = arith.addf %4, %6 : vector<8x16xf32>
    %cst_9 = arith.constant dense<0xFF800000> : vector<8xf32>
    %8 = vector.multi_reduction <maximumf>, %7, %cst_9 [1] : vector<8x16xf32> to vector<8xf32>
    %9 = vector.shape_cast %8 : vector<8xf32> to vector<8x1xf32>
    %10 = vector.broadcast %9 : vector<8x1xf32> to vector<8x16xf32>
    %11 = arith.subf %7, %10 : vector<8x16xf32>
    %12 = math.exp %11 : vector<8x16xf32>
    %cst_10 = arith.constant dense<0.000000e+00> : vector<8xf32>
    %13 = vector.multi_reduction <add>, %12, %cst_10 [1] : vector<8x16xf32> to vector<8xf32>
    %14 = vector.shape_cast %13 : vector<8xf32> to vector<8x1xf32>
    %15 = tpu.reciprocal %14 {approx = true} : vector<8x1xf32> -> vector<8x1xf32>
    %16 = vector.broadcast %15 : vector<8x1xf32> to vector<8x16xf32>
    %17 = arith.mulf %12, %16 : vector<8x16xf32>
    %c0_11 = arith.constant 0 : index
    %c0_12 = arith.constant 0 : index
    %c0_13 = arith.constant 0 : index
    %18 = vector.load %arg9[%c0_11, %c0_12, %c0_13] : memref<8x4x16xf32, #tpu.memory_space<vmem>>, vector<8x1x16xf32>
    %19 = vector.shape_cast %18 : vector<8x1x16xf32> to vector<8x16xf32>
    %20 = vector.shape_cast %17 : vector<8x16xf32> to vector<8x1x16xf32>
    tpu.vector_store %arg9[%c0_11, %c0_12, %c0_13], %20 {strides = array<i32>} : memref<8x4x16xf32, #tpu.memory_space<vmem>>, vector<8x1x16xf32>,
    %c0_14 = arith.constant 0 : index
    %c0_15 = arith.constant 0 : index
    %c0_16 = arith.constant 0 : index
    %21 = vector.load %arg4[%c0_14, %c0_15, %c0_16] : memref<1x16x160xf32, #tpu.memory_space<vmem>>, vector<1x16x40xf32>
    %22 = vector.shape_cast %21 : vector<1x16x40xf32> to vector<16x40xf32>
    %cst_17 = arith.constant dense<0.000000e+00> : vector<8x40xf32>
    %23 = tpu.matmul %17, %22, %cst_17 {dimension_numbers = #tpu.dot_dimension_numbers<[1], [0], [0], [1], [0, 0, 1, 1], [], []>} : vector<8x16xf32>, vector<16x40xf32>, vector<8x40xf32> -> vector<8x40xf32>
    %c0_18 = arith.constant 0 : index
    %c0_19 = arith.constant 0 : index
    %c0_20 = arith.constant 0 : index
    %24 = vector.load %arg7[%c0_18, %c0_19, %c0_20] : memref<1x8x160xf32, #tpu.memory_space<vmem>>, vector<1x8x40xf32>
    %25 = vector.shape_cast %24 : vector<1x8x40xf32> to vector<8x40xf32>
    %26 = vector.shape_cast %23 : vector<8x40xf32> to vector<1x8x40xf32>
    tpu.vector_store %arg7[%c0_18, %c0_19, %c0_20], %26 {strides = array<i32>} : memref<1x8x160xf32, #tpu.memory_space<vmem>>, vector<1x8x40xf32>,
    %c0_21 = arith.constant 0 : index
    %c0_22 = arith.constant 0 : index
    %c32 = arith.constant 32 : index
    %27 = vector.load %arg2[%c0_21, %c0_22, %c32] : memref<1x8x128xf32, #tpu.memory_space<vmem>>, vector<1x8x32xf32>
    %28 = vector.shape_cast %27 : vector<1x8x32xf32> to vector<8x32xf32>
    %c0_23 = arith.constant 0 : index
    %c0_24 = arith.constant 0 : index
    %c32_25 = arith.constant 32 : index
    %29 = vector.load %arg3[%c0_23, %c0_24, %c32_25] : memref<1x16x128xf32, #tpu.memory_space<vmem>>, vector<1x16x32xf32>
    %30 = vector.shape_cast %29 : vector<1x16x32xf32> to vector<16x32xf32>
    %cst_26 = arith.constant dense<0.000000e+00> : vector<8x16xf32>
    %31 = tpu.matmul %28, %30, %cst_26 {dimension_numbers = #tpu.dot_dimension_numbers<[1], [1], [0], [0], [0, 0, 1, 0], [], []>} : vector<8x32xf32>, vector<16x32xf32>, vector<8x16xf32> -> vector<8x16xf32>
    %c0_27 = arith.constant 0 : index
    %c1 = arith.constant 1 : index
    %c0_28 = arith.constant 0 : index
    %c0_29 = arith.constant 0 : index
    %32 = vector.load %arg5[%c0_27, %c1, %c0_28, %c0_29] : memref<1x4x8x16xf32, #tpu.memory_space<vmem>>, vector<1x1x8x16xf32>
    %33 = vector.shape_cast %32 : vector<1x1x8x16xf32> to vector<8x16xf32>
    %34 = arith.addf %31, %33 : vector<8x16xf32>
    %cst_30 = arith.constant dense<0xFF800000> : vector<8xf32>
    %35 = vector.multi_reduction <maximumf>, %34, %cst_30 [1] : vector<8x16xf32> to vector<8xf32>
    %36 = vector.shape_cast %35 : vector<8xf32> to vector<8x1xf32>
    %37 = vector.broadcast %36 : vector<8x1xf32> to vector<8x16xf32>
    %38 = arith.subf %34, %37 : vector<8x16xf32>
    %39 = math.exp %38 : vector<8x16xf32>
    %cst_31 = arith.constant dense<0.000000e+00> : vector<8xf32>
    %40 = vector.multi_reduction <add>, %39, %cst_31 [1] : vector<8x16xf32> to vector<8xf32>
    %41 = vector.shape_cast %40 : vector<8xf32> to vector<8x1xf32>
    %42 = tpu.reciprocal %41 {approx = true} : vector<8x1xf32> -> vector<8x1xf32>
    %43 = vector.broadcast %42 : vector<8x1xf32> to vector<8x16xf32>
    %44 = arith.mulf %39, %43 : vector<8x16xf32>
    %c0_32 = arith.constant 0 : index
    %c1_33 = arith.constant 1 : index
    %c0_34 = arith.constant 0 : index
    %45 = vector.load %arg9[%c0_32, %c1_33, %c0_34] : memref<8x4x16xf32, #tpu.memory_space<vmem>>, vector<8x1x16xf32>
    %46 = vector.shape_cast %45 : vector<8x1x16xf32> to vector<8x16xf32>
    %47 = vector.shape_cast %44 : vector<8x16xf32> to vector<8x1x16xf32>
    tpu.vector_store %arg9[%c0_32, %c1_33, %c0_34], %47 {strides = array<i32>} : memref<8x4x16xf32, #tpu.memory_space<vmem>>, vector<8x1x16xf32>,
    %c0_35 = arith.constant 0 : index
    %c0_36 = arith.constant 0 : index
    %c40 = arith.constant 40 : index
    %48 = vector.load %arg4[%c0_35, %c0_36, %c40] : memref<1x16x160xf32, #tpu.memory_space<vmem>>, vector<1x16x40xf32>
    %49 = vector.shape_cast %48 : vector<1x16x40xf32> to vector<16x40xf32>
    %cst_37 = arith.constant dense<0.000000e+00> : vector<8x40xf32>
    %50 = tpu.matmul %44, %49, %cst_37 {dimension_numbers = #tpu.dot_dimension_numbers<[1], [0], [0], [1], [0, 0, 1, 1], [], []>} : vector<8x16xf32>, vector<16x40xf32>, vector<8x40xf32> -> vector<8x40xf32>
    %c0_38 = arith.constant 0 : index
    %c0_39 = arith.constant 0 : index
    %c40_40 = arith.constant 40 : index
    %51 = vector.load %arg7[%c0_38, %c0_39, %c40_40] : memref<1x8x160xf32, #tpu.memory_space<vmem>>, vector<1x8x40xf32>
    %52 = vector.shape_cast %51 : vector<1x8x40xf32> to vector<8x40xf32>
    %53 = vector.shape_cast %50 : vector<8x40xf32> to vector<1x8x40xf32>
    tpu.vector_store %arg7[%c0_38, %c0_39, %c40_40], %53 {strides = array<i32>} : memref<1x8x160xf32, #tpu.memory_space<vmem>>, vector<1x8x40xf32>,
    %c0_41 = arith.constant 0 : index
    %c0_42 = arith.constant 0 : index
    %c64 = arith.constant 64 : index
    %54 = vector.load %arg2[%c0_41, %c0_42, %c64] : memref<1x8x128xf32, #tpu.memory_space<vmem>>, vector<1x8x32xf32>
    %55 = vector.shape_cast %54 : vector<1x8x32xf32> to vector<8x32xf32>
    %c0_43 = arith.constant 0 : index
    %c0_44 = arith.constant 0 : index
    %c64_45 = arith.constant 64 : index
    %56 = vector.load %arg3[%c0_43, %c0_44, %c64_45] : memref<1x16x128xf32, #tpu.memory_space<vmem>>, vector<1x16x32xf32>
    %57 = vector.shape_cast %56 : vector<1x16x32xf32> to vector<16x32xf32>
    %cst_46 = arith.constant dense<0.000000e+00> : vector<8x16xf32>
    %58 = tpu.matmul %55, %57, %cst_46 {dimension_numbers = #tpu.dot_dimension_numbers<[1], [1], [0], [0], [0, 0, 1, 0], [], []>} : vector<8x32xf32>, vector<16x32xf32>, vector<8x16xf32> -> vector<8x16xf32>
    %c0_47 = arith.constant 0 : index
    %c2 = arith.constant 2 : index
    %c0_48 = arith.constant 0 : index
    %c0_49 = arith.constant 0 : index
    %59 = vector.load %arg5[%c0_47, %c2, %c0_48, %c0_49] : memref<1x4x8x16xf32, #tpu.memory_space<vmem>>, vector<1x1x8x16xf32>
    %60 = vector.shape_cast %59 : vector<1x1x8x16xf32> to vector<8x16xf32>
    %61 = arith.addf %58, %60 : vector<8x16xf32>
    %cst_50 = arith.constant dense<0xFF800000> : vector<8xf32>
    %62 = vector.multi_reduction <maximumf>, %61, %cst_50 [1] : vector<8x16xf32> to vector<8xf32>
    %63 = vector.shape_cast %62 : vector<8xf32> to vector<8x1xf32>
    %64 = vector.broadcast %63 : vector<8x1xf32> to vector<8x16xf32>
    %65 = arith.subf %61, %64 : vector<8x16xf32>
    %66 = math.exp %65 : vector<8x16xf32>
    %cst_51 = arith.constant dense<0.000000e+00> : vector<8xf32>
    %67 = vector.multi_reduction <add>, %66, %cst_51 [1] : vector<8x16xf32> to vector<8xf32>
    %68 = vector.shape_cast %67 : vector<8xf32> to vector<8x1xf32>
    %69 = tpu.reciprocal %68 {approx = true} : vector<8x1xf32> -> vector<8x1xf32>
    %70 = vector.broadcast %69 : vector<8x1xf32> to vector<8x16xf32>
    %71 = arith.mulf %66, %70 : vector<8x16xf32>
    %c0_52 = arith.constant 0 : index
    %c2_53 = arith.constant 2 : index
    %c0_54 = arith.constant 0 : index
    %72 = vector.load %arg9[%c0_52, %c2_53, %c0_54] : memref<8x4x16xf32, #tpu.memory_space<vmem>>, vector<8x1x16xf32>
    %73 = vector.shape_cast %72 : vector<8x1x16xf32> to vector<8x16xf32>
    %74 = vector.shape_cast %71 : vector<8x16xf32> to vector<8x1x16xf32>
    tpu.vector_store %arg9[%c0_52, %c2_53, %c0_54], %74 {strides = array<i32>} : memref<8x4x16xf32, #tpu.memory_space<vmem>>, vector<8x1x16xf32>,
    %c0_55 = arith.constant 0 : index
    %c0_56 = arith.constant 0 : index
    %c80 = arith.constant 80 : index
    %75 = vector.load %arg4[%c0_55, %c0_56, %c80] : memref<1x16x160xf32, #tpu.memory_space<vmem>>, vector<1x16x40xf32>
    %76 = vector.shape_cast %75 : vector<1x16x40xf32> to vector<16x40xf32>
    %cst_57 = arith.constant dense<0.000000e+00> : vector<8x40xf32>
    %77 = tpu.matmul %71, %76, %cst_57 {dimension_numbers = #tpu.dot_dimension_numbers<[1], [0], [0], [1], [0, 0, 1, 1], [], []>} : vector<8x16xf32>, vector<16x40xf32>, vector<8x40xf32> -> vector<8x40xf32>
    %c0_58 = arith.constant 0 : index
    %c0_59 = arith.constant 0 : index
    %c80_60 = arith.constant 80 : index
    %78 = vector.load %arg7[%c0_58, %c0_59, %c80_60] : memref<1x8x160xf32, #tpu.memory_space<vmem>>, vector<1x8x40xf32>
    %79 = vector.shape_cast %78 : vector<1x8x40xf32> to vector<8x40xf32>
    %80 = vector.shape_cast %77 : vector<8x40xf32> to vector<1x8x40xf32>
    tpu.vector_store %arg7[%c0_58, %c0_59, %c80_60], %80 {strides = array<i32>} : memref<1x8x160xf32, #tpu.memory_space<vmem>>, vector<1x8x40xf32>,
    %c0_61 = arith.constant 0 : index
    %c0_62 = arith.constant 0 : index
    %c96 = arith.constant 96 : index
    %81 = vector.load %arg2[%c0_61, %c0_62, %c96] : memref<1x8x128xf32, #tpu.memory_space<vmem>>, vector<1x8x32xf32>
    %82 = vector.shape_cast %81 : vector<1x8x32xf32> to vector<8x32xf32>
    %c0_63 = arith.constant 0 : index
    %c0_64 = arith.constant 0 : index
    %c96_65 = arith.constant 96 : index
    %83 = vector.load %arg3[%c0_63, %c0_64, %c96_65] : memref<1x16x128xf32, #tpu.memory_space<vmem>>, vector<1x16x32xf32>
    %84 = vector.shape_cast %83 : vector<1x16x32xf32> to vector<16x32xf32>
    %cst_66 = arith.constant dense<0.000000e+00> : vector<8x16xf32>
    %85 = tpu.matmul %82, %84, %cst_66 {dimension_numbers = #tpu.dot_dimension_numbers<[1], [1], [0], [0], [0, 0, 1, 0], [], []>} : vector<8x32xf32>, vector<16x32xf32>, vector<8x16xf32> -> vector<8x16xf32>
    %c0_67 = arith.constant 0 : index
    %c3 = arith.constant 3 : index
    %c0_68 = arith.constant 0 : index
    %c0_69 = arith.constant 0 : index
    %86 = vector.load %arg5[%c0_67, %c3, %c0_68, %c0_69] : memref<1x4x8x16xf32, #tpu.memory_space<vmem>>, vector<1x1x8x16xf32>
    %87 = vector.shape_cast %86 : vector<1x1x8x16xf32> to vector<8x16xf32>
    %88 = arith.addf %85, %87 : vector<8x16xf32>
    %cst_70 = arith.constant dense<0xFF800000> : vector<8xf32>
    %89 = vector.multi_reduction <maximumf>, %88, %cst_70 [1] : vector<8x16xf32> to vector<8xf32>
    %90 = vector.shape_cast %89 : vector<8xf32> to vector<8x1xf32>
    %91 = vector.broadcast %90 : vector<8x1xf32> to vector<8x16xf32>
    %92 = arith.subf %88, %91 : vector<8x16xf32>
    %93 = math.exp %92 : vector<8x16xf32>
    %cst_71 = arith.constant dense<0.000000e+00> : vector<8xf32>
    %94 = vector.multi_reduction <add>, %93, %cst_71 [1] : vector<8x16xf32> to vector<8xf32>
    %95 = vector.shape_cast %94 : vector<8xf32> to vector<8x1xf32>
    %96 = tpu.reciprocal %95 {approx = true} : vector<8x1xf32> -> vector<8x1xf32>
    %97 = vector.broadcast %96 : vector<8x1xf32> to vector<8x16xf32>
    %98 = arith.mulf %93, %97 : vector<8x16xf32>
    %c0_72 = arith.constant 0 : index
    %c3_73 = arith.constant 3 : index
    %c0_74 = arith.constant 0 : index
    %99 = vector.load %arg9[%c0_72, %c3_73, %c0_74] : memref<8x4x16xf32, #tpu.memory_space<vmem>>, vector<8x1x16xf32>
    %100 = vector.shape_cast %99 : vector<8x1x16xf32> to vector<8x16xf32>
    %101 = vector.shape_cast %98 : vector<8x16xf32> to vector<8x1x16xf32>
    tpu.vector_store %arg9[%c0_72, %c3_73, %c0_74], %101 {strides = array<i32>} : memref<8x4x16xf32, #tpu.memory_space<vmem>>, vector<8x1x16xf32>,
    %c0_75 = arith.constant 0 : index
    %c0_76 = arith.constant 0 : index
    %c120 = arith.constant 120 : index
    %102 = vector.load %arg4[%c0_75, %c0_76, %c120] : memref<1x16x160xf32, #tpu.memory_space<vmem>>, vector<1x16x40xf32>
    %103 = vector.shape_cast %102 : vector<1x16x40xf32> to vector<16x40xf32>
    %cst_77 = arith.constant dense<0.000000e+00> : vector<8x40xf32>
    %104 = tpu.matmul %98, %103, %cst_77 {dimension_numbers = #tpu.dot_dimension_numbers<[1], [0], [0], [1], [0, 0, 1, 1], [], []>} : vector<8x16xf32>, vector<16x40xf32>, vector<8x40xf32> -> vector<8x40xf32>
    %c0_78 = arith.constant 0 : index
    %c0_79 = arith.constant 0 : index
    %c120_80 = arith.constant 120 : index
    %105 = vector.load %arg7[%c0_78, %c0_79, %c120_80] : memref<1x8x160xf32, #tpu.memory_space<vmem>>, vector<1x8x40xf32>
    %106 = vector.shape_cast %105 : vector<1x8x40xf32> to vector<8x40xf32>
    %107 = vector.shape_cast %104 : vector<8x40xf32> to vector<1x8x40xf32>
    tpu.vector_store %arg7[%c0_78, %c0_79, %c120_80], %107 {strides = array<i32>} : memref<1x8x160xf32, #tpu.memory_space<vmem>>, vector<1x8x40xf32>,
    %c0_81 = arith.constant 0 : index
    %c0_82 = arith.constant 0 : index
    %c0_83 = arith.constant 0 : index
    %c0_84 = arith.constant 0 : index
    %108 = vector.load %arg6[%c0_81, %c0_82, %c0_83, %c0_84] : memref<1x8x16x4xf32, #tpu.memory_space<vmem>>, vector<1x8x16x4xf32>
    %109 = vector.shape_cast %108 : vector<1x8x16x4xf32> to vector<8x16x4xf32>
    %c0_85 = arith.constant 0 : index
    %c0_86 = arith.constant 0 : index
    %c0_87 = arith.constant 0 : index
    %110 = vector.load %arg9[%c0_85, %c0_86, %c0_87] : memref<8x4x16xf32, #tpu.memory_space<vmem>>, vector<8x4x16xf32>
    %cst_88 = arith.constant dense<0.000000e+00> : vector<8x4x4xf32>
    %111 = tpu.matmul %110, %109, %cst_88 {dimension_numbers = #tpu.dot_dimension_numbers<[2], [1], [1], [2], [0, 0, 0, 1, 1, 2], [0], [0]>} : vector<8x4x16xf32>, vector<8x16x4xf32>, vector<8x4x4xf32> -> vector<8x4x4xf32>
    %c0_89 = arith.constant 0 : index
    %c0_90 = arith.constant 0 : index
    %c0_91 = arith.constant 0 : index
    %c0_92 = arith.constant 0 : index
    %112 = vector.load %arg8[%c0_89, %c0_90, %c0_91, %c0_92] : memref<1x8x4x4xf32, #tpu.memory_space<vmem>>, vector<1x8x4x4xf32>
    %113 = vector.shape_cast %112 : vector<1x8x4x4xf32> to vector<8x4x4xf32>
    %114 = vector.shape_cast %111 : vector<8x4x4xf32> to vector<1x8x4x4xf32>
    tpu.vector_store %arg8[%c0_89, %c0_90, %c0_91, %c0_92], %114 {strides = array<i32>} : memref<1x8x4x4xf32, #tpu.memory_space<vmem>>, vector<1x8x4x4xf32>,
    return
  }
  func.func @transform_0(%arg0: i32, %arg1: i32) -> (i32, i32, i32) {
    %c0_i32 = arith.constant 0 : i32
    %c0_i32_0 = arith.constant 0 : i32
    return %arg0, %arg1, %c0_i32 : i32, i32, i32
  }
  func.func @transform_1(%arg0: i32, %arg1: i32) -> (i32, i32, i32) {
    %c0_i32 = arith.constant 0 : i32
    %c0_i32_0 = arith.constant 0 : i32
    %c0_i32_1 = arith.constant 0 : i32
    return %arg0, %c0_i32, %c0_i32_0 : i32, i32, i32
  }
  func.func @transform_2(%arg0: i32, %arg1: i32) -> (i32, i32, i32) {
    %c0_i32 = arith.constant 0 : i32
    %c0_i32_0 = arith.constant 0 : i32
    %c0_i32_1 = arith.constant 0 : i32
    return %arg0, %c0_i32, %c0_i32_0 : i32, i32, i32
  }
  func.func @transform_3(%arg0: i32, %arg1: i32) -> (i32, i32, i32, i32) {
    %c0_i32 = arith.constant 0 : i32
    %c0_i32_0 = arith.constant 0 : i32
    %c0_i32_1 = arith.constant 0 : i32
    return %arg0, %c0_i32, %arg1, %c0_i32_0 : i32, i32, i32, i32
  }
  func.func @transform_4(%arg0: i32, %arg1: i32) -> (i32, i32, i32, i32) {
    %c0_i32 = arith.constant 0 : i32
    %c0_i32_0 = arith.constant 0 : i32
    %c0_i32_1 = arith.constant 0 : i32
    return %arg0, %arg1, %c0_i32, %c0_i32_0 : i32, i32, i32, i32
  }
  func.func @transform_5(%arg0: i32, %arg1: i32) -> (i32, i32, i32) {
    %c0_i32 = arith.constant 0 : i32
    %c0_i32_0 = arith.constant 0 : i32
    return %arg0, %arg1, %c0_i32 : i32, i32, i32
  }
  func.func @transform_6(%arg0: i32, %arg1: i32) -> (i32, i32, i32, i32) {
    %c0_i32 = arith.constant 0 : i32
    %c0_i32_0 = arith.constant 0 : i32
    %c0_i32_1 = arith.constant 0 : i32
    return %arg0, %arg1, %c0_i32, %c0_i32_0 : i32, i32, i32, i32
  }
}

</mosaic_0001>

<bundles_post_ra>
// kernel: tpu_custom_call.1
= control target key start
LH: loop header
LB: loop body
LE: loop exit
PB: predicated region body
PF: predicated region fallthrough
CT: control target
= control target key end

     0   :  { %s1939_s0 = inlined_call_operand.vmem [shape: f32[2,16,128], index: 0, kind: input, shape index: {}]   ;;  %s1940_s1 = inlined_call_operand.vmem [shape: f32[2,16,128], index: 1, kind: input, shape index: {}]   ;;  %s1941_s2 = inlined_call_operand.vmem [shape: f32[2,16,160], index: 2, kind: input, shape index: {}]   ;;  %s1942_s3 = inlined_call_operand.vmem [shape: f32[2,4,16,16], index: 3, kind: input, shape index: {}]   ;;  %s1943_s4 = inlined_call_operand.vmem [shape: f32[2,16,16,4], index: 4, kind: input, shape index: {}]   ;;  %s1944_s5 = inlined_call_operand.hbm [shape: f32[2,16,160], index: 5, kind: output, shape index: {0}]   ;;  %s1945_s6 = inlined_call_operand.vmem [shape: f32[2,16,4,4], index: 6, kind: output, shape index: {1}]  }
   0x1   :  { %1948 = sst [smem:[#allocation8_spill]] %s1942_s3 }
   0x2   :  { %12 = vsyncpa [#allocation5], 0 }
   0x3   :  { %14 = vsyncpa [#allocation5 + $0x1], 0  ;;  %s1637_s21 = smov 0   ;;  %s1639_s22 = smov 0  }
   0x4   :  { %s1641_s23 = smov 0   ;;  %s1643_s24 = smov 0  }
   0x5   :  { %s1645_s25 = smov 0   ;;  %s1647_s26 = smov 0  }
   0x6   :  { %s1649_s27 = smov 0   ;;  %s1651_s28 = smov 0  }
   0x7 LB: > { %s1323_s29 = sadd.s32 4294967295, %s1591_s28   ;;  %s1324_s30 = sadd.s32 4294967294, %s1591_s28   ;;  %s1591_s28 = sphi %s1651_s28, %s20_s28   ;;  %s1587_s27 = sphi %s1649_s27, %s1962_s27   ;;  %s1583_s26 = sphi %s1647_s26, %s1961_s26   ;;  %s1579_s25 = sphi %s1645_s25, %s1960_s25   ;;  %s1575_s24 = sphi %s1643_s24, %s1959_s24   ;;  %s1571_s23 = sphi %s1641_s23, %s1958_s23   ;;  %s1567_s22 = sphi %s1639_s22, %s1957_s22   ;;  %s1563_s21 = sphi %s1637_s21, %s1956_s21  }
   0x8   : > { %s29_s7 = sadd.s32 1, %s1583_s26  ;;  %s32_s8 = sadd.s32 1, %s1587_s27 }
   0x9   : > { %p30_p0 = scmp.ge.s32.totalorder %s29_s7, 2  ;;  %p128_p1 = scmp.ne.s32.totalorder %s1571_s23, %s1567_s22 }
   0xa   : > { %p129_p2 = scmp.eq.s32.totalorder %s1591_s28, 0  ;;  %p188_p5 = scmp.eq.s32.totalorder %s1323_s29, 3 }
   0xb   : > { %s1964_s7 = smov (%p30_p0, %s29_s7), 0  ;;  %s1966_s8 = smov (!%p30_p0, %s32_s8), %s1587_s27 }
   0xc   : > { %s117_s9 = ssub.s32 %s1583_s26, %s1964_s7  ;;  %p1689_p3 = por %p129_p2, %p128_p1 }
   0xd   : > { %p34_p4 = scmp.ge.s32.totalorder %s1966_s8, 2  ;;  %p193_p6 = scmp.ne.s32.totalorder %s1567_s22, %s1563_s21 }
   0xe   : > { %p194_p7 = scmp.eq.s32.totalorder %s1324_s30, 3  ;;  %p1697_p8 = por %p188_p5, %p128_p1 }
   0xf   : > { %s1968_s8 = smov (%p34_p4, %s1966_s8), 0  ;;  %s121_s15 = sadd.s32 1, %s1571_s23 }
  0x10   : > { %1950 = sst [smem:[#allocation7_spill]] %s1968_s8  ;;  %p1701_p9 = por %p194_p7, %p193_p6 }
  0x11   : > { %s116_s13 = ssub.s32 %s1587_s27, %s1968_s8  ;;  %p1326_p11 = scmp.ge.s32.totalorder %s1591_s28, 4 }
  0x12   : > { %s118_s14 = sor.u32 %s117_s9, %s116_s13 }
  0x13   : > { %p119_p10 = scmp.eq.s32.totalorder %s118_s14, 0  ;;  %238 = sbr.rel (%p1326_p11) target bundleno = 38 (0x26), region = 16 }
  0x15   : > { %s1709_s16 = scalar_select %p119_p10, %s1571_s23, %s121_s15  }
  0x18   : > { %268 = sbr.rel (!%p1689_p3) target bundleno = 38 (0x26), region = 32  ;;  %s270_s17 = sand.u32 (%p1689_p3), 1, %s1571_s23  }
  0x19   : > { %s1328_s18 = sshll.u32 (%p1689_p3), %s1587_s27, 3  ;;  %s1327_s19 = sshll.u32 (%p1689_p3), %s270_s17, 5 }
  0x1a   : > { %s274_s20 = sadd.s32 (%p1689_p3), %s1583_s26, %s1328_s18  ;;  %s1953_s3 = sld [smem:[#allocation8_spill]] (%p1689_p3) }
  0x1b   : > { %s1329_s29 = sshll.u32 (%p1689_p3), %s274_s20, 3  ;;  %s272_s14 = scalar_lea.vmem (%p1689_p3), [#allocation3], %s1327_s19 }
  0x20   : > { %s276_s13 = scalar_lea.vmem %s1953_s3, %s1329_s29 }
  0x21   : > { %v311_v0 = vld [vmem:[%s276_s13] sm:$0xff]  ;;  %v313_v1 = vld [vmem:[%s276_s13 + $0x10] sm:$0xff] }
  0x22   : > { %v315_v2 = vld [vmem:[%s276_s13 + $0x20] sm:$0xff]  ;;  %312 = vst [vmem:[%s272_s14] sm:$0xff] %v311_v0  ;;  %v317_v3 = vld [vmem:[%s276_s13 + $0x30] sm:$0xff] }
  0x23   : > { %314 = vst [vmem:[%s272_s14 + $0x8] sm:$0xff] %v313_v1 }
  0x24   : > { %316 = vst [vmem:[%s272_s14 + $0x10] sm:$0xff] %v315_v2 }
  0x25   : > { %318 = vst [vmem:[%s272_s14 + $0x18] sm:$0xff] %v317_v3 }
  0x26 PF: > { %p1330_p12 = scmp.ge.s32.totalorder %s1591_s28, 1  ;;  %p337_p13 = scmp.lt.s32.totalorder %s1591_s28, 5 }
  0x28   : > { %p338_p0 = pnand %p1330_p12, %p337_p13 }
  0x29   : > { %p410_p1 = scmp.lt.s32.totalorder (!%p338_p0), %s1579_s25, 1  ;;  %p412_p2 = scmp.lt.s32.totalorder (!%p338_p0), %s1575_s24, 1 }
  0x2a   : > { %341 = sbr.rel (%p338_p0) target bundleno = 1105 (0x451), region = 74  ;;  %s1593_s8 = smov (!%p338_p0), 96  }
  0x2b   : > { %s1742_s19 = sand.u32 (!%p338_p0), 1, %s1567_s22   ;;  %s1595_s20 = smov (!%p338_p0), 32  }
  0x2f   : > { %s1725_s10 = scalar_select %p410_p1, %s1579_s25, 1  ;;  %vm453_vm0 = vcmask 261120   ;;  %vm483_vm1 = vcmask 130048   ;;  %vm510_vm2 = vcmask 122880   ;;  %vm543_vm3 = vcmask 326656  }
  0x30   : > { %s413_s15 = scalar_select %p412_p2, %s1575_s24, 1  ;;  %vm859_vm4 = vcmask 64512   ;;  %vm655_vm5 = vcmask 654656   ;;  %vm1101_vm6 = vcmask 27648   ;;  %vm767_vm7 = vcmask 982656  }
  0x31   : > { %s1947_s17 = sshll.u32 %s1725_s10, 4  ;;  %s1333_s18 = sshll.u32 %s1725_s10, 1  ;;  %vm890_vm8 = vcmask 1048512  }
  0x32   : > { %s422_s29 = scalar_lea.vmem %s1940_s1, %s1947_s17  ;;  %s415_s30 = sadd.s32 %s1333_s18, %s413_s15 }
  0x33   : > { %v451_v4 = vld [vmem:[%s422_s29 + $0x8] sm:$0xff]  ;;  %s1334_s9 = sshll.u32 %s415_s30, 3  ;;  %v450_v5 = vld [vmem:[%s422_s29] sm:$0xff]  ;;  %s1331_s15 = sshll.u32 %s1742_s19, 5 }
  0x34   : > { %1346 = vmatpush.xpose.msk.msra.mxu0 %vm453_vm0, %v451_v4  ;;  %s417_s3 = scalar_lea.vmem %s1939_s0, %s1334_s9  ;;  %555 = vrot.lane.b32.xlu1 %v450_v5, %s1593_s8  ;;  %s1745_s18 = scalar_lea.vmem [#allocation3], %s1331_s15 }
  0x35   : > { %v449_v6 = vld [vmem:[%s417_s3] sm:$0xff]  ;;  %s1594_s3 = smov 64   ;;  %s1380_s29 = sshll.u32 %s1725_s10, 5  ;;  %v1350_v37 = vld [vmem:[%s1745_s18 + $0x8] sm:$0xff]  ;;  %v1355_v42 = vld [vmem:[%s1745_s18 + $0x10] sm:$0xff] }
  0x36   : > { %551 = vrot.lane.b32.xlu2 %v449_v6, %s1593_s8  ;;  %v452_v7 = vld [vmem:[%s1745_s18] sm:$0xff]  ;;  %s1755_s13 = scalar_lea.vmem %s1941_s2, %s1380_s29  ;;  %v1360_v46 = vld [vmem:[%s1745_s18 + $0x18] sm:$0xff]  ;;  %s1596_s15 = smov 88  }
  0x37   : > { %v1758_v15 = vld [vmem:[%s1755_s13 + $0x10] sm:$0xff]  ;;  %v1761_v16 = vld [vmem:[%s1755_s13] sm:$0xff]  ;;  %v844_v62 = vld [vmem:[%s1755_s13 + $0x8] sm:$0xff]  ;;  %s1597_s18 = smov 8   ;;  %s1599_s17 = smov 40  }
  0x38   : > { %1347 = vmatpush.xpose.msk.msra.mxu0 %vm453_vm0, %v450_v5  ;;  %537 = vmatpush.msra.mxu1 %v1758_v15  ;;  %v1461_v55 = vpack.i.bf16 %v1761_v16, %v1758_v15  ;;  %v1476_v1 = vpack.i.bf16 %v844_v62, %v1761_v16 }
  0x3a   : > { %538 = vmatpush.msra.mxu1 %v1761_v16 }
  0x3b   : > { %1348 = vmatmul.msk.f32.vlgmr.msra.gmra.mxu0 %vm453_vm0, %v449_v6 }
  0x3e   : > { %669 = vrot.lane.b32.xlu2 %v451_v4, %s1594_s3 }
  0x46   : > { %781 = vrot.lane.b32.xlu2 %v451_v4, %s1595_s20 }
  0x4e   : > { %667 = vrot.lane.b32.xlu2 %v450_v5, %s1594_s3 }
  0x56   : > { %663 = vrot.lane.b32.xlu2 %v449_v6, %s1594_s3  ;;  %s1598_s3 = smov 48  }
  0x90   : > { %v552_v13 = vpop.permute.xlu2 %551 }
  0x98   : > { %v670_v17 = vpop.permute.xlu2 %669 }
  0x99   : > { %1356 = vmatpush.xpose.msk.msrb.mxu1 %vm453_vm0, %v670_v17 }
  0xa0   : > { %v782_v22 = vpop.permute.xlu2 %781 }
  0xa1   : > { %1361 = vmatpush.xpose.msk.msrb.mxu0 %vm453_vm0, %v782_v22 }
  0xa6   : > { %v556_v21 = vpop.permute.xlu1 %555 }
  0xa8   : > { %v668_v23 = vpop.permute.xlu2 %667 }
  0xa9   : > { %1357 = vmatpush.xpose.msk.msrb.mxu1 %vm453_vm0, %v668_v23 }
  0xb0   : > { %v664_v35 = vpop.permute.xlu2 %663 }
  0xb8   : > { %v480_v8 = vpop.f32.mrf.mxu0 }
  0xb9   : > { %v481_v9 = vadd.f32 %v480_v8, %v452_v7 }
  0xbb   : > { %v484_v10 = vsel %vm483_vm1, %v481_v9, -inf }
  0xbc   : > { %485 = vmax.xlane.f32.xlu0 %v484_v10 }
  0xd0   : > { %557 = vrot.lane.b32.xlu0 %v451_v4, %s1593_s8  ;;  %s1332_s8 = sshll.u32 %s1742_s19, 4 }
  0xd1   : > { %s1787_s14 = scalar_lea.vmem [#allocation4], %s1332_s8 }
  0xd8   : > { %779 = vrot.lane.b32.xlu0 %v450_v5, %s1595_s20 }
 0x12f   : > { %v486_v11 = vpop.xlane.xlu0 %485 }
 0x130   : > { %v487_v12 = vsub.f32 %v481_v9, %v486_v11 }
 0x132   : > { %v488_v14 = vmul.f32 1.442695, %v487_v12 }
 0x134   : > { %1481 = vpow2.f32 %v488_v14 }
 0x13a   : > { %v1482_v18 = vpop.eup %1481 }
 0x13b   : > { %v490_v19 = vsel %vm483_vm1, %v1482_v18, 0.0 }
 0x13c   : > { %491 = vadd.xlane.f32.xlu1 %v490_v19 }
 0x142   : > { %v558_v20 = vpop.permute.xlu0 %557 }
 0x143   : > { %1351 = vmatpush.xpose.msk.msra.mxu2 %vm453_vm0, %v558_v20 }
 0x147   : > { %1352 = vmatpush.xpose.msk.msra.mxu2 %vm453_vm0, %v556_v21 }
 0x14a   : > { %1353 = vmatmul.msk.f32.vlgmr.msra.gmra.mxu2 %vm453_vm0, %v552_v13  ;;  %v780_v24 = vpop.permute.xlu0 %779 }
 0x14b   : > { %1362 = vmatpush.xpose.msk.msrb.mxu0 %vm453_vm0, %v780_v24 }
 0x155   : > { %775 = vrot.lane.b32.xlu1 %v449_v6, %s1595_s20  ;;  %s1339_s20 = sshll.u32 %s1575_s24, 3 }
 0x156   : > { %p431_p3 = scmp.lt.s32.totalorder %s1339_s20, 15 }
 0x158   : > { %s1970_s20 = smov (!%p431_p3, %s1339_s20), 15 }
 0x159   : > { %s1340_s30 = sshll.u32 %s1970_s20, 1 }
 0x15a   : > { %s435_s9 = sadd.s32 %s1380_s29, %s1340_s30  ;;  %s1954_s29 = sshll.u32 %s1725_s10, 4 }
 0x15b   : > { %s1342_s8 = sshll.u32 %s435_s9, 3  ;;  %s1600_s10 = smov 80  }
 0x15c   : > { %s1135_s9 = sshll.u32 %s1787_s14, 4  ;;  %s1136_s9 = int_to_ptr.vmem [resolvable:$true] %s1135_s9 }
 0x1af   : > { %v492_v25 = vpop.xlane.xlu1 %491 }
 0x1b0   : > { %1483 = vrcp.f32 %v492_v25 }
 0x1b6   : > { %v1484_v26 = vpop.eup %1483 }
 0x1b7   : > { %v494_v27 = vmul.f32 %v1484_v26, %v1482_v18  ;;  %v846_v18 = vld [vmem:[%s1755_s13 + $0x18] sm:$0xff]  ;;  %s1829_s13 = scalar_lea.vmem %s1943_s4, %s1342_s8 }
 0x1b8   : > { %v1471_v19 = vpack.i.bf16 %v846_v18, %v1758_v15  ;;  %v894_v15 = vld [vmem:[%s1829_s13 + $0x8] sm:$0xff]  ;;  %v893_v20 = vld [vmem:[%s1829_s13] sm:$0xff]  ;;  %v895_v62 = vld [vmem:[%s1829_s13 + $0x10] sm:$0xff] }
 0x1b9   : > { %1349 = vmatmul.msk.f32.vlgmr.msra.gmra.mxu1 %vm483_vm1, %v494_v27  ;;  %511 = vst.msk [vmem:[#allocation2] sm:$0x1] %vm510_vm2, %v494_v27  ;;  %v497_v28 = vrot.slane %v494_v27, 2  ;;  %v499_v29 = vrot.slane %v494_v27, 4  ;;  %v501_v30 = vrot.slane %v494_v27, 6  ;;  %v496_v31 = vrot.slane %v494_v27, 1 }
 0x1ba   : > { %v498_v32 = vrot.slane %v494_v27, 3  ;;  %v500_v33 = vrot.slane %v494_v27, 5  ;;  %v502_v34 = vrot.slane %v494_v27, 7  ;;  %v898_v21 = vld [vmem:[%s1829_s13 + $0x28] sm:$0xff]  ;;  %934 = vmatpush.msra.mxu1 %v894_v15  ;;  %v897_v22 = vld [vmem:[%s1829_s13 + $0x20] sm:$0xff] }
 0x1bb   : > { %513 = vst.msk [vmem:[#allocation2 + $0x8] sm:$0x1] %vm510_vm2, %v497_v28  ;;  %980 = vmatpush.msra.mxu0 %v898_v21  ;;  %v902_v23 = vld [vmem:[%s1829_s13 + $0x48] sm:$0xff]  ;;  %v901_v24 = vld [vmem:[%s1829_s13 + $0x40] sm:$0xff] }
 0x1bc   : > { %515 = vst.msk [vmem:[#allocation2 + $0x10] sm:$0x1] %vm510_vm2, %v499_v29  ;;  %935 = vmatpush.msra.mxu1 %v893_v20  ;;  %v906_v25 = vld [vmem:[%s1829_s13 + $0x68] sm:$0xff]  ;;  %v905_v27 = vld [vmem:[%s1829_s13 + $0x60] sm:$0xff] }
 0x1bd   : > { %517 = vst.msk [vmem:[#allocation2 + $0x18] sm:$0x1] %vm510_vm2, %v501_v30  ;;  %981 = vmatpush.msra.mxu0 %v897_v22 }
 0x1be   : > { %512 = vst.msk [vmem:[#allocation2 + $0x4] sm:$0x1] %vm510_vm2, %v496_v31 }
 0x1bf   : > { %514 = vst.msk [vmem:[#allocation2 + $0xc] sm:$0x1] %vm510_vm2, %v498_v32 }
 0x1c0   : > { %516 = vst.msk [vmem:[#allocation2 + $0x14] sm:$0x1] %vm510_vm2, %v500_v33 }
 0x1c1   : > { %1358 = vmatmul.msk.f32.vlgmr.msrb.gmra.mxu1 %vm453_vm0, %v664_v35  ;;  %518 = vst.msk [vmem:[#allocation2 + $0x1c] sm:$0x1] %vm510_vm2, %v502_v34 }
 0x1c2   : > { %1026 = vmatpush.msrb.mxu1 %v902_v23 }
 0x1c4   : > { %1027 = vmatpush.msrb.mxu1 %v901_v24 }
 0x1c7   : > { %v776_v36 = vpop.permute.xlu1 %775 }
 0x1c8   : > { %1363 = vmatmul.msk.f32.vlgmr.msrb.gmra.mxu0 %vm453_vm0, %v776_v36 }
 0x1c9   : > { %1072 = vmatpush.msrb.mxu0 %v906_v25 }
 0x1cb   : > { %1073 = vmatpush.msrb.mxu0 %v905_v27 }
 0x1cd   : > { %v582_v38 = vpop.f32.mrf.mxu2 }
 0x1ce   : > { %v583_v39 = vadd.f32 %v1350_v37, %v582_v38 }
 0x1d0   : > { %v585_v40 = vsel %vm483_vm1, %v583_v39, -inf }
 0x1d1   : > { %586 = vmax.xlane.f32.xlu0 %v585_v40 }
 0x236   : > { %v540_v41 = vpop.f32.mrf.mxu1 }
 0x237   : > { %544 = vst.msk [vmem:[%s1787_s14] sm:$0xff] %vm543_vm3, %v540_v41 }
 0x23e   : > { %v694_v43 = vpop.f32.mrf.mxu1 }
 0x23f   : > { %v695_v44 = vadd.f32 %v1355_v42, %v694_v43 }
 0x241   : > { %v697_v45 = vsel %vm483_vm1, %v695_v44, -inf }
 0x242   : > { %698 = vmax.xlane.f32.xlu2 %v697_v45 }
 0x244   : > { %v587_v47 = vpop.xlane.xlu0 %586 }
 0x245   : > { %v588_v48 = vsub.f32 %v583_v39, %v587_v47  ;;  %v806_v49 = vpop.f32.mrf.mxu0 }
 0x246   : > { %v807_v50 = vadd.f32 %v1360_v46, %v806_v49 }
 0x247   : > { %v589_v51 = vmul.f32 1.442695, %v588_v48 }
 0x248   : > { %v809_v52 = vsel %vm483_vm1, %v807_v50, -inf }
 0x249   : > { %1485 = vpow2.f32 %v589_v51  ;;  %810 = vmax.xlane.f32.xlu1 %v809_v52 }
 0x24f   : > { %v1486_v53 = vpop.eup %1485 }
 0x250   : > { %v591_v54 = vsel %vm483_vm1, %v1486_v53, 0.0 }
 0x251   : > { %592 = vadd.xlane.f32.xlu0 %v591_v54 }
 0x25a   : > { %1462 = vrot.lane.b32.xlu2 %v1461_v55, %s1596_s15  ;;  %s1374_s15 = sshll.u32 %s1575_s24, 1  ;;  %s1111_s24 = scalar_lea.sflag [#allocation5], %s1742_s19 }
 0x262   : > { %1477 = vrot.lane.b32.xlu2 %v1476_v1, %s1597_s18  ;;  %v904_v1 = vld [vmem:[%s1829_s13 + $0x58] sm:$0xff] }
 0x2b5   : > { %v699_v56 = vpop.xlane.xlu2 %698 }
 0x2b6   : > { %v700_v57 = vsub.f32 %v695_v44, %v699_v56 }
 0x2b8   : > { %v701_v58 = vmul.f32 1.442695, %v700_v57 }
 0x2ba   : > { %1487 = vpow2.f32 %v701_v58 }
 0x2bc   : > { %v811_v59 = vpop.xlane.xlu1 %810 }
 0x2bd   : > { %v812_v60 = vsub.f32 %v807_v50, %v811_v59  ;;  %v1463_v61 = vpop.permute.xlu2 %1462  ;;  %v896_v59 = vld [vmem:[%s1829_s13 + $0x18] sm:$0xff] }
 0x2be   : > { %v1464_v63 = vunpack.i.l.bf16 %v1463_v61  ;;  %v1465_v0 = vunpack.i.h.bf16 %v1463_v61 }
 0x2bf   : > { %v813_v2 = vmul.f32 1.442695, %v812_v60 }
 0x2c0   : > { %v1799_v3 = vpop.eup %1487  ;;  %645 = vmatpush.msra.mxu3 %v1464_v63  ;;  %v900_v63 = vld [vmem:[%s1829_s13 + $0x38] sm:$0xff] }
 0x2c1   : > { %1489 = vpow2.f32 %v813_v2  ;;  %v703_v4 = vsel %vm483_vm1, %v1799_v3, 0.0  ;;  %v899_v2 = vld [vmem:[%s1829_s13 + $0x30] sm:$0xff] }
 0x2c2   : > { %704 = vadd.xlane.f32.xlu1 %v703_v4  ;;  %646 = vmatpush.msra.mxu3 %v1465_v0  ;;  %v903_v4 = vld [vmem:[%s1829_s13 + $0x50] sm:$0xff] }
 0x2c4   : > { %v593_v5 = vpop.xlane.xlu0 %592 }
 0x2c5   : > { %1491 = vrcp.f32 %v593_v5  ;;  %v1478_v46 = vpop.permute.xlu2 %1477  ;;  %v908_v5 = vld [vmem:[%s1829_s13 + $0x78] sm:$0xff] }
 0x2c6   : > { %v1480_v51 = vunpack.i.h.bf16 %v1478_v46  ;;  %v1479_v52 = vunpack.i.l.bf16 %v1478_v46 }
 0x2c7   : > { %v1804_v6 = vpop.eup %1489 }
 0x2c8   : > { %v815_v7 = vsel %vm483_vm1, %v1804_v6, 0.0  ;;  %v860_v61 = vsel %vm859_vm4, %v1479_v52, %v1480_v51 }
 0x2c9   : > { %816 = vadd.xlane.f32.xlu0 %v815_v7 }
 0x2cb   : > { %v1492_v8 = vpop.eup %1491 }
 0x2cc   : > { %v595_v9 = vmul.f32 %v1492_v8, %v1486_v53 }
 0x2ce   : > { %1354 = vmatmul.msk.f32.vlgmr.msra.gmra.mxu3 %vm483_vm1, %v595_v9  ;;  %611 = vst.msk [vmem:[#allocation2 + $0x1] sm:$0x1] %vm510_vm2, %v595_v9  ;;  %v598_v10 = vrot.slane %v595_v9, 2  ;;  %v600_v11 = vrot.slane %v595_v9, 4  ;;  %v602_v12 = vrot.slane %v595_v9, 6  ;;  %v597_v13 = vrot.slane %v595_v9, 1 }
 0x2cf   : > { %v599_v14 = vrot.slane %v595_v9, 3  ;;  %v601_v16 = vrot.slane %v595_v9, 5  ;;  %v603_v17 = vrot.slane %v595_v9, 7 }
 0x2d0   : > { %613 = vst.msk [vmem:[#allocation2 + $0x9] sm:$0x1] %vm510_vm2, %v598_v10 }
 0x2d1   : > { %615 = vst.msk [vmem:[#allocation2 + $0x11] sm:$0x1] %vm510_vm2, %v600_v11 }
 0x2d2   : > { %617 = vst.msk [vmem:[#allocation2 + $0x19] sm:$0x1] %vm510_vm2, %v602_v12 }
 0x2d3   : > { %612 = vst.msk [vmem:[#allocation2 + $0x5] sm:$0x1] %vm510_vm2, %v597_v13 }
 0x2d4   : > { %614 = vst.msk [vmem:[#allocation2 + $0xd] sm:$0x1] %vm510_vm2, %v599_v14 }
 0x2d5   : > { %616 = vst.msk [vmem:[#allocation2 + $0x15] sm:$0x1] %vm510_vm2, %v601_v16 }
 0x2d6   : > { %618 = vst.msk [vmem:[#allocation2 + $0x1d] sm:$0x1] %vm510_vm2, %v603_v17 }
 0x2db   : > { %1467 = vrot.lane.b32.xlu1 %v1461_v55, %s1598_s3 }
 0x2dd   : > { %1472 = vrot.lane.b32.xlu0 %v1471_v19, %s1597_s18  ;;  %s445_s18 = sadd.s32 %s1954_s29, %s1970_s20  ;;  %s1601_s20 = smov 120  }
 0x2de   : > { %s1345_s3 = sshll.u32 %s445_s18, 2 }
 0x2df   : > { %s447_s8 = scalar_lea.vmem %s1945_s6, %s1345_s3 }
 0x335   : > { %v705_v26 = vpop.xlane.xlu1 %704 }
 0x336   : > { %1493 = vrcp.f32 %v705_v26 }
 0x33c   : > { %v1494_v28 = vpop.eup %1493  ;;  %v817_v29 = vpop.xlane.xlu0 %816 }
 0x33d   : > { %v707_v30 = vmul.f32 %v1494_v28, %v1799_v3  ;;  %1495 = vrcp.f32 %v817_v29 }
 0x33f   : > { %723 = vst.msk [vmem:[#allocation2 + $0x2] sm:$0x1] %vm510_vm2, %v707_v30  ;;  %v710_v31 = vrot.slane %v707_v30, 2  ;;  %v712_v32 = vrot.slane %v707_v30, 4  ;;  %v714_v33 = vrot.slane %v707_v30, 6  ;;  %v709_v34 = vrot.slane %v707_v30, 1 }
 0x340   : > { %v711_v35 = vrot.slane %v707_v30, 3  ;;  %v713_v37 = vrot.slane %v707_v30, 5  ;;  %v715_v45 = vrot.slane %v707_v30, 7 }
 0x341   : > { %725 = vst.msk [vmem:[#allocation2 + $0xa] sm:$0x1] %vm510_vm2, %v710_v31 }
 0x342   : > { %727 = vst.msk [vmem:[#allocation2 + $0x12] sm:$0x1] %vm510_vm2, %v712_v32 }
 0x343   : > { %v1496_v36 = vpop.eup %1495  ;;  %729 = vst.msk [vmem:[#allocation2 + $0x1a] sm:$0x1] %vm510_vm2, %v714_v33 }
 0x344   : > { %v819_v38 = vmul.f32 %v1496_v36, %v1804_v6  ;;  %724 = vst.msk [vmem:[#allocation2 + $0x6] sm:$0x1] %vm510_vm2, %v709_v34  ;;  %v907_v6 = vld [vmem:[%s1829_s13 + $0x70] sm:$0xff]  ;;  %s1375_s13 = sshll.u32 %s1579_s25, 2 }
 0x345   : > { %726 = vst.msk [vmem:[#allocation2 + $0xe] sm:$0x1] %vm510_vm2, %v711_v35 }
 0x346   : > { %835 = vst.msk [vmem:[#allocation2 + $0x3] sm:$0x1] %vm510_vm2, %v819_v38  ;;  %v822_v39 = vrot.slane %v819_v38, 2  ;;  %v824_v40 = vrot.slane %v819_v38, 4  ;;  %v826_v41 = vrot.slane %v819_v38, 6  ;;  %v821_v42 = vrot.slane %v819_v38, 1 }
 0x347   : > { %728 = vst.msk [vmem:[#allocation2 + $0x16] sm:$0x1] %vm510_vm2, %v713_v37  ;;  %v823_v43 = vrot.slane %v819_v38, 3  ;;  %v825_v44 = vrot.slane %v819_v38, 5  ;;  %v827_v47 = vrot.slane %v819_v38, 7 }
 0x348   : > { %837 = vst.msk [vmem:[#allocation2 + $0xb] sm:$0x1] %vm510_vm2, %v822_v39 }
 0x349   : > { %839 = vst.msk [vmem:[#allocation2 + $0x13] sm:$0x1] %vm510_vm2, %v824_v40 }
 0x34a   : > { %841 = vst.msk [vmem:[#allocation2 + $0x1b] sm:$0x1] %vm510_vm2, %v826_v41 }
 0x34b   : > { %836 = vst.msk [vmem:[#allocation2 + $0x7] sm:$0x1] %vm510_vm2, %v821_v42 }
 0x34c   : > { %838 = vst.msk [vmem:[#allocation2 + $0xf] sm:$0x1] %vm510_vm2, %v823_v43 }
 0x34d   : > { %v1468_v48 = vpop.permute.xlu1 %1467  ;;  %v909_v49 = vld [vmem:[#allocation2] sm:$0xf]  ;;  %840 = vst.msk [vmem:[#allocation2 + $0x17] sm:$0x1] %vm510_vm2, %v825_v44 }
 0x34e   : > { %1365 = vmatmul.msk.f32.vlgmr.msra.gmra.mxu1 %vm483_vm1, %v909_v49  ;;  %v1469_v50 = vunpack.i.l.bf16 %v1468_v48  ;;  %v1470_v53 = vunpack.i.h.bf16 %v1468_v48  ;;  %730 = vst.msk [vmem:[#allocation2 + $0x1e] sm:$0x1] %vm510_vm2, %v715_v45 }
 0x34f   : > { %v1473_v54 = vpop.permute.xlu0 %1472  ;;  %v911_v55 = vld [vmem:[#allocation2 + $0x8] sm:$0xf]  ;;  %842 = vst.msk [vmem:[#allocation2 + $0x1f] sm:$0x1] %vm510_vm2, %v827_v47 }
 0x350   : > { %v1475_v56 = vunpack.i.h.bf16 %v1473_v54  ;;  %v1474_v57 = vunpack.i.l.bf16 %v1473_v54  ;;  %757 = vmatpush.msrb.mxu3 %v1469_v50  ;;  %1367 = vmatmul.msk.f32.vlgmr.msra.gmra.mxu0 %vm483_vm1, %v911_v55  ;;  %v913_v0 = vld [vmem:[#allocation2 + $0x10] sm:$0xf] }
 0x351   : > { %v648_v58 = vpop.f32.mrf.mxu3  ;;  %v915_v3 = vld [vmem:[#allocation2 + $0x18] sm:$0xf] }
 0x352   : > { %758 = vmatpush.msrb.mxu3 %v1470_v53  ;;  %652 = vrot.lane.b32.xlu2 %v648_v58, %s1599_s17  ;;  %v861_v60 = vsel %vm859_vm4, %v1474_v57, %v1475_v56  ;;  %v910_v7 = vld [vmem:[#allocation2 + $0x4] sm:$0xf]  ;;  %s1131_s17 = sadd.s32 %s1375_s13, %s1374_s15  ;;  %s1517_s13 = scalar_lea.hbm %s1944_s5, 64 }
 0x353   : > { %1359 = vmatmul.msk.f32.vlgmr.msrb.gmra.mxu3 %vm483_vm1, %v707_v30  ;;  %880 = vmatpush.msrb.mxu2 %v861_v60  ;;  %v912_v8 = vld [vmem:[#allocation2 + $0xc] sm:$0xf]  ;;  %s1376_s29 = sshll.u32 %s1131_s17, 3 }
 0x354   : > { %957 = vmatpush.msra.mxu3 %v896_v59  ;;  %v914_v9 = vld [vmem:[#allocation2 + $0x14] sm:$0xf]  ;;  %s1133_s30 = scalar_lea.hbm %s1944_s5, %s1376_s29 }
 0x355   : > { %881 = vmatpush.msrb.mxu2 %v860_v61 }
 0x356   : > { %1364 = vmatmul.msk.f32.vlgmr.msrb.gmra.mxu2 %vm483_vm1, %v819_v38  ;;  %1369 = vmatmul.msk.f32.vlgmr.msrb.gmra.mxu1 %vm483_vm1, %v913_v0  ;;  %v916_v10 = vld [vmem:[#allocation2 + $0x1c] sm:$0xf] }
 0x357   : > { %958 = vmatpush.msra.mxu3 %v895_v62  ;;  %1003 = vmatpush.msra.mxu2 %v900_v63 }
 0x358   : > { %1371 = vmatmul.msk.f32.vlgmr.msrb.gmra.mxu0 %vm483_vm1, %v915_v3 }
 0x359   : > { %1049 = vmatpush.msrb.mxu3 %v904_v1  ;;  %1004 = vmatpush.msra.mxu2 %v899_v2 }
 0x35b   : > { %1050 = vmatpush.msrb.mxu3 %v903_v4  ;;  %1095 = vmatpush.msrb.mxu2 %v908_v5 }
 0x35c   : > { %1366 = vmatmul.msk.f32.vlgmr.msra.gmra.mxu3 %vm483_vm1, %v910_v7 }
 0x35d   : > { %1096 = vmatpush.msrb.mxu2 %v907_v6 }
 0x35e   : > { %1368 = vmatmul.msk.f32.vlgmr.msra.gmra.mxu2 %vm483_vm1, %v912_v8 }
 0x364   : > { %1370 = vmatmul.msk.f32.vlgmr.msrb.gmra.mxu3 %vm483_vm1, %v914_v9 }
 0x366   : > { %1372 = vmatmul.msk.f32.vlgmr.msrb.gmra.mxu2 %vm483_vm1, %v916_v10 }
 0x3ac   : > { %v653_v11 = vpop.permute.xlu2 %652 }
 0x3ad   : > { %656 = vst.msk [vmem:[%s1787_s14] sm:$0xff] %vm655_vm5, %v653_v11 }
 0x3cb   : > { %v937_v12 = vpop.f32.mrf.mxu1 }
 0x3cc   : > { %1102 = vst.msk [vmem:[%s447_s8] sm:$0xf] %vm1101_vm6, %v937_v12 }
 0x3cd   : > { %v983_v13 = vpop.f32.mrf.mxu0 }
 0x3ce   : > { %1104 = vst.msk [vmem:[%s447_s8 + $0x8] sm:$0xf] %vm1101_vm6, %v983_v13 }
 0x3d3   : > { %v1029_v14 = vpop.f32.mrf.mxu1 }
 0x3d4   : > { %1106 = vst.msk [vmem:[%s447_s8 + $0x10] sm:$0xf] %vm1101_vm6, %v1029_v14 }
 0x3d5   : > { %v1075_v16 = vpop.f32.mrf.mxu0 }
 0x3d6   : > { %1108 = vst.msk [vmem:[%s447_s8 + $0x18] sm:$0xf] %vm1101_vm6, %v1075_v16  ;;  %v760_v17 = vpop.f32.mrf.mxu3 }
 0x3d7   : > { %764 = vrot.lane.b32.xlu0 %v760_v17, %s1600_s10  ;;  %s1137_s10 = sshll.u32 %s1133_s30, 4  ;;  %s1138_s10 = int_to_ptr.hbm [resolvable:$true] %s1137_s10 }
 0x3d8   : > { %s1511_s25 = sshra.s32 %s1138_s10, 4  ;;  %s1512_s25 = int_to_ptr.hbm [resolvable:$true] %s1511_s25 }
 0x3d9   : > { %v883_v18 = vpop.f32.mrf.mxu2  ;;  %p1518_p7 = scmp.lt.s32.totalorder %s1512_s25, %s1944_s5 }
 0x3da   : > { %887 = vrot.lane.b32.xlu1 %v883_v18, %s1601_s20 }
 0x3df   : > { %v960_v19 = vpop.f32.mrf.mxu3 }
 0x3e0   : > { %1103 = vst.msk [vmem:[%s447_s8 + $0x4] sm:$0xf] %vm1101_vm6, %v960_v19 }
 0x3e1   : > { %v1006_v15 = vpop.f32.mrf.mxu2 }
 0x3e2   : > { %1105 = vst.msk [vmem:[%s447_s8 + $0xc] sm:$0xf] %vm1101_vm6, %v1006_v15 }
 0x3e7   : > { %v1052_v20 = vpop.f32.mrf.mxu3 }
 0x3e8   : > { %1107 = vst.msk [vmem:[%s447_s8 + $0x14] sm:$0xf] %vm1101_vm6, %v1052_v20 }
 0x3e9   : > { %v1098_v21 = vpop.f32.mrf.mxu2 }
 0x3ea   : > { %1109 = vst.msk [vmem:[%s447_s8 + $0x1c] sm:$0xf] %vm1101_vm6, %v1098_v21  ;;  %s1513_s8 = scalar_lea.hbm %s1512_s25, 16 }
 0x3eb   : > { %p1514_p4 = scmp.ne.s32.totalorder %s1512_s25, %s1513_s8  ;;  %p1519_p10 = scmp.lt.s32.totalorder %s1517_s13, %s1513_s8 }
 0x3ed   : > { %p1515_p5 = pnand %p1514_p4, %p1697_p8  ;;  %p1520_p11 = por %p1519_p10, %p1518_p7 }
 0x3ef   : > { %p1516_p6 = pneg %p1515_p5 }
 0x3f1   : > { %p1521_p12 = pnand %p1520_p11, %p1516_p6 }
 0x449   : > { %v765_v22 = vpop.permute.xlu0 %764 }
 0x44a   : > { %768 = vst.msk [vmem:[%s1787_s14] sm:$0xff] %vm767_vm7, %v765_v22 }
 0x44c   : > { %v888_v23 = vpop.permute.xlu1 %887 }
 0x44d   : > { %891 = vst.msk [vmem:[%s1787_s14] sm:$0xff] %vm890_vm8, %v888_v23 }
 0x44e   : > { %892 = vst.msk [vmem:[%s1787_s14 + $0x8] sm:$0xff] %vm453_vm0, %v888_v23 }
 0x44f   : > { %1524 = shalt.err (!%p1521_p12)
}
 0x450   : > { %1381 = dma.vmem_to_hbm [thread:$0]  (%p1697_p8), %s1136_s9, 256, %s1138_s10, %s1111_s24  }
 0x451 PF: > { %p1387_p13 = scmp.ge.s32.totalorder %s1591_s28, 2  ;;  %s1153_s19 = sand.u32 1, %s1563_s21  }
 0x452   : > { %s1154_s14 = scalar_lea.sflag [#allocation5], %s1153_s19 }
 0x453   : > { %p1384_p0 = pnand %p1387_p13, %p1701_p9 }
 0x455   : > { %p1385_p1 = pneg %p1384_p0 }
 0x457   : > { %1558 = dma.done.wait (%p1385_p1), %s1154_s14, 256  }
 0x458   : > { %1560 = vsyncadd (%p1385_p1), %s1154_s14, 4294967040  ;;  %s20_s28 = sadd.s32 1, %s1591_s28   ;;  %s1955_s11 = sld [smem:[#allocation7_spill]] }
 0x459   : > { %p17_p2 = scmp.ge.s32.totalorder %s20_s28, 6   ;;  %s1956_s21 = smov %s1567_s22 }
 0x45a   : > { %s1957_s22 = smov %s1571_s23  ;;  %s1958_s23 = smov %s1709_s16 }
 0x45b   : > { %s1959_s24 = smov %s1583_s26  ;;  %s1960_s25 = smov %s1587_s27 }
 0x45c   : > { %s1961_s26 = smov %s1964_s7  ;;  %19 = sbr.rel (!%p17_p2) target bundleno = 7 (0x7), region = 145 }
 0x45e   : > { %s1962_s27 = smov %s1955_s11 }
 0x461   :  { %1172 = vsyncpa [#allocation5], 1 }
 0x462   :  { %1174 = vsyncpa [#allocation5 + $0x1], 1 }

</bundles_post_ra>
